<compile_context>
chip_gen: v7x
topology: tpu7x:2x2x1
jax: 0.10.0
libtpu: 0.0.40
codegen_flags: <defaults>
</compile_context>

<pallas_src>
import functools

import jax
import jax.numpy as jnp
from jax.experimental import pallas as pl
from jax.experimental.pallas import tpu as pltpu


def _round_up(x, m):
    return (x + m - 1) // m * m


def _ff_embed_kernel(users_ref, movies_ref, utab_ref, mtab_ref,
                     w1u_ref, w1m_ref, b1_ref, w2_ref, b2_ref, wf_ref, bf_ref,
                     out_ref, *, n_users, n_movies, min_rating, max_rating):
    cdt = jnp.bfloat16
    tile_b = users_ref.shape[0]

    # --- fused embedding gather (one-hot matmul against resident tables) ---
    iota_u = jax.lax.broadcasted_iota(jnp.int32, (tile_b, n_users), 1)
    iota_m = jax.lax.broadcasted_iota(jnp.int32, (tile_b, n_movies), 1)
    oh_u = jnp.where(users_ref[...] == iota_u, 1.0, 0.0).astype(cdt)
    oh_m = jnp.where(movies_ref[...] == iota_m, 1.0, 0.0).astype(cdt)
    u = jnp.dot(oh_u, utab_ref[...], preferred_element_type=jnp.float32)
    m = jnp.dot(oh_m, mtab_ref[...], preferred_element_type=jnp.float32)

    # --- hidden layer 1: split-weight form of concat([u, m]) @ W1 + b1 ------
    h = (jnp.dot(u.astype(cdt), w1u_ref[...], preferred_element_type=jnp.float32)
         + jnp.dot(m.astype(cdt), w1m_ref[...], preferred_element_type=jnp.float32)
         + b1_ref[...])
    h = jnp.maximum(h, 0.0)

    # --- hidden layer 2 (the extra F.relu in forward() is redundant) --------
    h = jnp.dot(h.astype(cdt), w2_ref[...],
                preferred_element_type=jnp.float32) + b2_ref[...]
    h = jnp.maximum(h, 0.0)

    # --- final fc as VPU multiply + XLU lane-reduction (avoid N=1 matmul) ---
    logits = jnp.sum(h * wf_ref[...], axis=-1, keepdims=True) + bf_ref[...]
    out = jax.nn.sigmoid(logits)
    out_ref[...] = (out * (max_rating - min_rating) + min_rating).astype(out_ref.dtype)


def init_params(key, n_users, n_movies, n_factors, hidden):
    """Deterministic parameter init mimicking the PyTorch module's shapes."""
    assert len(hidden) == 2, "this script instantiates the module with 2 hidden layers"
    keys = jax.random.split(key, 8)

    def uniform(k, shape, fan_in):
        bound = 1.0 / jnp.sqrt(jnp.float32(fan_in))
        return jax.random.uniform(k, shape, jnp.float32, -bound, bound)

    d_in = 2 * n_factors
    return {
        "user_emb": jax.random.normal(keys[0], (n_users, n_factors), jnp.float32),
        "movie_emb": jax.random.normal(keys[1], (n_movies, n_factors), jnp.float32),
        "w1": uniform(keys[2], (d_in, hidden[0]), d_in),
        "b1": uniform(keys[3], (1, hidden[0]), d_in),
        "w2": uniform(keys[4], (hidden[0], hidden[1]), hidden[0]),
        "b2": uniform(keys[5], (1, hidden[1]), hidden[0]),
        "wf": uniform(keys[6], (hidden[1], 1), hidden[1]),
        "bf": uniform(keys[7], (1, 1), hidden[1]),
    }


def feedforward_embed_nn(users, movies, params, min_rating=0.5, max_rating=5.0,
                         max_tile_b=1024):
    """Forward pass of FeedForwardEmbedNN.  users/movies: int [B]."""
    n_users, n_factors = params["user_emb"].shape
    n_movies, _ = params["movie_emb"].shape
    d_in = 2 * n_factors
    h1 = params["w1"].shape[1]
    h2 = params["w2"].shape[1]

    B = int(users.shape[0])
    tile_b = min(max_tile_b, _round_up(B, 8))          # multiple of 8 (sublane rule)
    b_pad = _round_up(B, tile_b)
    grid = (b_pad // tile_b,)

    users_p = jnp.zeros((b_pad, 1), jnp.int32).at[:B, 0].set(users.astype(jnp.int32))
    movies_p = jnp.zeros((b_pad, 1), jnp.int32).at[:B, 0].set(movies.astype(jnp.int32))

    cdt = jnp.bfloat16
    utab = params["user_emb"].astype(cdt)
    mtab = params["movie_emb"].astype(cdt)
    w1u = params["w1"][:n_factors, :].astype(cdt)       # user half of W1
    w1m = params["w1"][n_factors:, :].astype(cdt)       # movie half of W1
    b1 = params["b1"].astype(jnp.float32)
    w2 = params["w2"].astype(cdt)
    b2 = params["b2"].astype(jnp.float32)
    wf_row = params["wf"].reshape(1, h2).astype(jnp.float32)
    bf = params["bf"].reshape(1, 1).astype(jnp.float32)

    kernel = functools.partial(
        _ff_embed_kernel, n_users=n_users, n_movies=n_movies,
        min_rating=min_rating, max_rating=max_rating)

    def batched(shape):
        return pl.BlockSpec(shape, lambda i: (i, 0))

    def resident(shape):
        return pl.BlockSpec(shape, lambda i: (0, 0))

    flops = 2 * b_pad * (n_users * n_factors + n_movies * n_factors
                         + d_in * h1 + h1 * h2 + h2)
    bytes_accessed = ((users_p.size + movies_p.size) * 4            # ids
                      + (utab.size + mtab.size) * 2                 # bf16 tables
                      + (w1u.size + w1m.size + w2.size) * 2         # bf16 weights
                      + (b1.size + b2.size + wf_row.size + bf.size) * 4
                      + b_pad * 4)                                  # output
    cost = pl.CostEstimate(flops=flops, transcendentals=b_pad,
                           bytes_accessed=bytes_accessed)

    out = pl.pallas_call(
        kernel,
        out_shape=jax.ShapeDtypeStruct((b_pad, 1), jnp.float32),
        grid=grid,
        in_specs=[
            batched((tile_b, 1)),            # user ids
            batched((tile_b, 1)),            # movie ids
            resident((n_users, n_factors)),  # user table
            resident((n_movies, n_factors)), # movie table
            resident((n_factors, h1)),       # W1 (user half)
            resident((n_factors, h1)),       # W1 (movie half)
            resident((1, h1)),               # b1
            resident((h1, h2)),              # W2
            resident((1, h2)),               # b2
            resident((1, h2)),               # wf as row
            resident((1, 1)),                # bf
        ],
        out_specs=batched((tile_b, 1)),
        compiler_params=pltpu.CompilerParams(
            dimension_semantics=("parallel",),
            vmem_limit_bytes=32 * 1024 * 1024),
        cost_estimate=cost,
    )(users_p, movies_p, utab, mtab, w1u, w1m, b1, w2, b2, wf_row, bf)

    return out[:B]


if __name__ == "__main__":
    # Small, module-consistent shapes.
    n_users, n_movies = 32, 48
    n_factors = 16              # -> concat feature dim 32
    hidden = [64, 32]
    batch = 8

    key = jax.random.PRNGKey(0)
    pkey, ukey, mkey = jax.random.split(key, 3)
    params = init_params(pkey, n_users, n_movies, n_factors, hidden)

    users = jax.random.randint(ukey, (batch,), 0, n_users, dtype=jnp.int32)
    movies = jax.random.randint(mkey, (batch,), 0, n_movies, dtype=jnp.int32)

    out = feedforward_embed_nn(users, movies, params)
    jax.block_until_ready(out)

    assert out.shape == (batch, 1)
    assert bool(jnp.all(out >= 0.5)) and bool(jnp.all(out <= 5.0))
    print("KERNEL_OK")
</pallas_src>

<mosaic_0001>
module attributes {stable_mosaic.version = 11 : i64} {
  func.func @_ff_embed_kernel(%arg0: i32, %arg1: memref<8x1xi32, #tpu.memory_space<vmem>>, %arg2: memref<8x1xi32, #tpu.memory_space<vmem>>, %arg3: memref<32x16xbf16, #tpu.memory_space<vmem>>, %arg4: memref<48x16xbf16, #tpu.memory_space<vmem>>, %arg5: memref<16x64xbf16, #tpu.memory_space<vmem>>, %arg6: memref<16x64xbf16, #tpu.memory_space<vmem>>, %arg7: memref<1x64xf32, #tpu.memory_space<vmem>>, %arg8: memref<64x32xbf16, #tpu.memory_space<vmem>>, %arg9: memref<1x32xf32, #tpu.memory_space<vmem>>, %arg10: memref<1x32xf32, #tpu.memory_space<vmem>>, %arg11: memref<1x1xf32, #tpu.memory_space<vmem>>, %arg12: memref<8x1xf32, #tpu.memory_space<vmem>>) attributes {dimension_semantics = [#tpu.dimension_semantics<parallel>], iteration_bounds = array<i64: 1>, scalar_prefetch = 0 : i64, scratch_operands = 0 : i64, tpu.core_type = #tpu.core_type<tc>, window_params = [{transform_indices = @transform_0, window_bounds = array<i64: 8, 1>}, {transform_indices = @transform_1, window_bounds = array<i64: 8, 1>}, {pipeline_mode = #tpu.pipeline_mode<synchronous>, transform_indices = @transform_2, window_bounds = array<i64: 32, 16>}, {pipeline_mode = #tpu.pipeline_mode<synchronous>, transform_indices = @transform_3, window_bounds = array<i64: 48, 16>}, {pipeline_mode = #tpu.pipeline_mode<synchronous>, transform_indices = @transform_4, window_bounds = array<i64: 16, 64>}, {pipeline_mode = #tpu.pipeline_mode<synchronous>, transform_indices = @transform_5, window_bounds = array<i64: 16, 64>}, {pipeline_mode = #tpu.pipeline_mode<synchronous>, transform_indices = @transform_6, window_bounds = array<i64: 1, 64>}, {pipeline_mode = #tpu.pipeline_mode<synchronous>, transform_indices = @transform_7, window_bounds = array<i64: 64, 32>}, {pipeline_mode = #tpu.pipeline_mode<synchronous>, transform_indices = @transform_8, window_bounds = array<i64: 1, 32>}, {pipeline_mode = #tpu.pipeline_mode<synchronous>, transform_indices = @transform_9, window_bounds = array<i64: 1, 32>}, {pipeline_mode = #tpu.pipeline_mode<synchronous>, transform_indices = @transform_10, window_bounds = array<i64: 1, 1>}, {transform_indices = @transform_11, window_bounds = array<i64: 8, 1>}]} {
    %0 = tpu.iota {dimensions = array<i32: 1>} : vector<8x32xi32>
    %1 = tpu.iota {dimensions = array<i32: 1>} : vector<8x48xi32>
    %c0 = arith.constant 0 : index
    %c0_0 = arith.constant 0 : index
    %2 = vector.load %arg1[%c0, %c0_0] : memref<8x1xi32, #tpu.memory_space<vmem>>, vector<8x1xi32>
    %3 = vector.broadcast %2 : vector<8x1xi32> to vector<8x32xi32>
    %4 = arith.cmpi eq, %3, %0 : vector<8x32xi32>
    %cst = arith.constant 1.000000e+00 : f32
    %cst_1 = arith.constant 0.000000e+00 : f32
    %5 = vector.broadcast %cst : f32 to vector<8x32xf32>
    %6 = vector.broadcast %cst_1 : f32 to vector<8x32xf32>
    %7 = arith.select %4, %5, %6 : vector<8x32xi1>, vector<8x32xf32>
    %8 = arith.truncf %7 : vector<8x32xf32> to vector<8x32xbf16>
    %c0_2 = arith.constant 0 : index
    %c0_3 = arith.constant 0 : index
    %9 = vector.load %arg2[%c0_2, %c0_3] : memref<8x1xi32, #tpu.memory_space<vmem>>, vector<8x1xi32>
    %10 = vector.broadcast %9 : vector<8x1xi32> to vector<8x48xi32>
    %11 = arith.cmpi eq, %10, %1 : vector<8x48xi32>
    %cst_4 = arith.constant 1.000000e+00 : f32
    %cst_5 = arith.constant 0.000000e+00 : f32
    %12 = vector.broadcast %cst_4 : f32 to vector<8x48xf32>
    %13 = vector.broadcast %cst_5 : f32 to vector<8x48xf32>
    %14 = arith.select %11, %12, %13 : vector<8x48xi1>, vector<8x48xf32>
    %15 = arith.truncf %14 : vector<8x48xf32> to vector<8x48xbf16>
    %c0_6 = arith.constant 0 : index
    %c0_7 = arith.constant 0 : index
    %16 = vector.load %arg3[%c0_6, %c0_7] : memref<32x16xbf16, #tpu.memory_space<vmem>>, vector<32x16xbf16>
    %cst_8 = arith.constant dense<0.000000e+00> : vector<8x16xf32>
    %17 = tpu.matmul %8, %16, %cst_8 {dimension_numbers = #tpu.dot_dimension_numbers<[1], [0], [0], [1], [0, 0, 1, 1], [], []>} : vector<8x32xbf16>, vector<32x16xbf16>, vector<8x16xf32> -> vector<8x16xf32>
    %c0_9 = arith.constant 0 : index
    %c0_10 = arith.constant 0 : index
    %18 = vector.load %arg4[%c0_9, %c0_10] : memref<48x16xbf16, #tpu.memory_space<vmem>>, vector<48x16xbf16>
    %cst_11 = arith.constant dense<0.000000e+00> : vector<8x16xf32>
    %19 = tpu.matmul %15, %18, %cst_11 {dimension_numbers = #tpu.dot_dimension_numbers<[1], [0], [0], [1], [0, 0, 1, 1], [], []>} : vector<8x48xbf16>, vector<48x16xbf16>, vector<8x16xf32> -> vector<8x16xf32>
    %20 = arith.truncf %17 : vector<8x16xf32> to vector<8x16xbf16>
    %c0_12 = arith.constant 0 : index
    %c0_13 = arith.constant 0 : index
    %21 = vector.load %arg5[%c0_12, %c0_13] : memref<16x64xbf16, #tpu.memory_space<vmem>>, vector<16x64xbf16>
    %cst_14 = arith.constant dense<0.000000e+00> : vector<8x64xf32>
    %22 = tpu.matmul %20, %21, %cst_14 {dimension_numbers = #tpu.dot_dimension_numbers<[1], [0], [0], [1], [0, 0, 1, 1], [], []>} : vector<8x16xbf16>, vector<16x64xbf16>, vector<8x64xf32> -> vector<8x64xf32>
    %23 = arith.truncf %19 : vector<8x16xf32> to vector<8x16xbf16>
    %c0_15 = arith.constant 0 : index
    %c0_16 = arith.constant 0 : index
    %24 = vector.load %arg6[%c0_15, %c0_16] : memref<16x64xbf16, #tpu.memory_space<vmem>>, vector<16x64xbf16>
    %cst_17 = arith.constant dense<0.000000e+00> : vector<8x64xf32>
    %25 = tpu.matmul %23, %24, %cst_17 {dimension_numbers = #tpu.dot_dimension_numbers<[1], [0], [0], [1], [0, 0, 1, 1], [], []>} : vector<8x16xbf16>, vector<16x64xbf16>, vector<8x64xf32> -> vector<8x64xf32>
    %26 = arith.addf %22, %25 : vector<8x64xf32>
    %c0_18 = arith.constant 0 : index
    %c0_19 = arith.constant 0 : index
    %27 = vector.load %arg7[%c0_18, %c0_19] : memref<1x64xf32, #tpu.memory_space<vmem>>, vector<1x64xf32>
    %28 = vector.broadcast %27 : vector<1x64xf32> to vector<8x64xf32>
    %29 = arith.addf %26, %28 : vector<8x64xf32>
    %cst_20 = arith.constant 0.000000e+00 : f32
    %30 = vector.broadcast %cst_20 : f32 to vector<8x64xf32>
    %31 = arith.maximumf %29, %30 : vector<8x64xf32>
    %32 = arith.truncf %31 : vector<8x64xf32> to vector<8x64xbf16>
    %c0_21 = arith.constant 0 : index
    %c0_22 = arith.constant 0 : index
    %33 = vector.load %arg8[%c0_21, %c0_22] : memref<64x32xbf16, #tpu.memory_space<vmem>>, vector<64x32xbf16>
    %cst_23 = arith.constant dense<0.000000e+00> : vector<8x32xf32>
    %34 = tpu.matmul %32, %33, %cst_23 {dimension_numbers = #tpu.dot_dimension_numbers<[1], [0], [0], [1], [0, 0, 1, 1], [], []>} : vector<8x64xbf16>, vector<64x32xbf16>, vector<8x32xf32> -> vector<8x32xf32>
    %c0_24 = arith.constant 0 : index
    %c0_25 = arith.constant 0 : index
    %35 = vector.load %arg9[%c0_24, %c0_25] : memref<1x32xf32, #tpu.memory_space<vmem>>, vector<1x32xf32>
    %36 = vector.broadcast %35 : vector<1x32xf32> to vector<8x32xf32>
    %37 = arith.addf %34, %36 : vector<8x32xf32>
    %cst_26 = arith.constant 0.000000e+00 : f32
    %38 = vector.broadcast %cst_26 : f32 to vector<8x32xf32>
    %39 = arith.maximumf %37, %38 : vector<8x32xf32>
    %c0_27 = arith.constant 0 : index
    %c0_28 = arith.constant 0 : index
    %40 = vector.load %arg10[%c0_27, %c0_28] : memref<1x32xf32, #tpu.memory_space<vmem>>, vector<1x32xf32>
    %41 = vector.broadcast %40 : vector<1x32xf32> to vector<8x32xf32>
    %42 = arith.mulf %39, %41 : vector<8x32xf32>
    %cst_29 = arith.constant dense<0.000000e+00> : vector<8xf32>
    %43 = vector.multi_reduction <add>, %42, %cst_29 [1] : vector<8x32xf32> to vector<8xf32>
    %44 = vector.shape_cast %43 : vector<8xf32> to vector<8x1xf32>
    %c0_30 = arith.constant 0 : index
    %c0_31 = arith.constant 0 : index
    %45 = vector.load %arg11[%c0_30, %c0_31] : memref<1x1xf32, #tpu.memory_space<vmem>>, vector<1x1xf32>
    %46 = vector.broadcast %45 : vector<1x1xf32> to vector<8x1xf32>
    %47 = arith.addf %44, %46 : vector<8x1xf32>
    %48 = arith.negf %47 : vector<8x1xf32>
    %49 = math.exp %48 : vector<8x1xf32>
    %cst_32 = arith.constant 1.000000e+00 : f32
    %50 = vector.broadcast %cst_32 : f32 to vector<8x1xf32>
    %51 = arith.addf %50, %49 : vector<8x1xf32>
    %52 = arith.divf %50, %51 : vector<8x1xf32>
    %cst_33 = arith.constant 4.500000e+00 : f32
    %53 = vector.broadcast %cst_33 : f32 to vector<8x1xf32>
    %54 = arith.mulf %52, %53 : vector<8x1xf32>
    %cst_34 = arith.constant 5.000000e-01 : f32
    %55 = vector.broadcast %cst_34 : f32 to vector<8x1xf32>
    %56 = arith.addf %54, %55 : vector<8x1xf32>
    %c0_35 = arith.constant 0 : index
    %c0_36 = arith.constant 0 : index
    %57 = vector.load %arg12[%c0_35, %c0_36] : memref<8x1xf32, #tpu.memory_space<vmem>>, vector<8x1xf32>
    tpu.vector_store %arg12[%c0_35, %c0_36], %56 {strides = array<i32>} : memref<8x1xf32, #tpu.memory_space<vmem>>, vector<8x1xf32>,
    return
  }
  func.func @transform_0(%arg0: i32) -> (i32, i32) {
    %c0_i32 = arith.constant 0 : i32
    %c0_i32_0 = arith.constant 0 : i32
    return %arg0, %c0_i32 : i32, i32
  }
  func.func @transform_1(%arg0: i32) -> (i32, i32) {
    %c0_i32 = arith.constant 0 : i32
    %c0_i32_0 = arith.constant 0 : i32
    return %arg0, %c0_i32 : i32, i32
  }
  func.func @transform_2(%arg0: i32) -> (i32, i32) {
    %c0_i32 = arith.constant 0 : i32
    %c0_i32_0 = arith.constant 0 : i32
    %c0_i32_1 = arith.constant 0 : i32
    return %c0_i32, %c0_i32_0 : i32, i32
  }
  func.func @transform_3(%arg0: i32) -> (i32, i32) {
    %c0_i32 = arith.constant 0 : i32
    %c0_i32_0 = arith.constant 0 : i32
    %c0_i32_1 = arith.constant 0 : i32
    return %c0_i32, %c0_i32_0 : i32, i32
  }
  func.func @transform_4(%arg0: i32) -> (i32, i32) {
    %c0_i32 = arith.constant 0 : i32
    %c0_i32_0 = arith.constant 0 : i32
    %c0_i32_1 = arith.constant 0 : i32
    return %c0_i32, %c0_i32_0 : i32, i32
  }
  func.func @transform_5(%arg0: i32) -> (i32, i32) {
    %c0_i32 = arith.constant 0 : i32
    %c0_i32_0 = arith.constant 0 : i32
    %c0_i32_1 = arith.constant 0 : i32
    return %c0_i32, %c0_i32_0 : i32, i32
  }
  func.func @transform_6(%arg0: i32) -> (i32, i32) {
    %c0_i32 = arith.constant 0 : i32
    %c0_i32_0 = arith.constant 0 : i32
    %c0_i32_1 = arith.constant 0 : i32
    return %c0_i32, %c0_i32_0 : i32, i32
  }
  func.func @transform_7(%arg0: i32) -> (i32, i32) {
    %c0_i32 = arith.constant 0 : i32
    %c0_i32_0 = arith.constant 0 : i32
    %c0_i32_1 = arith.constant 0 : i32
    return %c0_i32, %c0_i32_0 : i32, i32
  }
  func.func @transform_8(%arg0: i32) -> (i32, i32) {
    %c0_i32 = arith.constant 0 : i32
    %c0_i32_0 = arith.constant 0 : i32
    %c0_i32_1 = arith.constant 0 : i32
    return %c0_i32, %c0_i32_0 : i32, i32
  }
  func.func @transform_9(%arg0: i32) -> (i32, i32) {
    %c0_i32 = arith.constant 0 : i32
    %c0_i32_0 = arith.constant 0 : i32
    %c0_i32_1 = arith.constant 0 : i32
    return %c0_i32, %c0_i32_0 : i32, i32
  }
  func.func @transform_10(%arg0: i32) -> (i32, i32) {
    %c0_i32 = arith.constant 0 : i32
    %c0_i32_0 = arith.constant 0 : i32
    %c0_i32_1 = arith.constant 0 : i32
    return %c0_i32, %c0_i32_0 : i32, i32
  }
  func.func @transform_11(%arg0: i32) -> (i32, i32) {
    %c0_i32 = arith.constant 0 : i32
    %c0_i32_0 = arith.constant 0 : i32
    return %arg0, %c0_i32 : i32, i32
  }
}

</mosaic_0001>

<bundles_post_ra>
// kernel: tpu_custom_call.1
= control target key start
LH: loop header
LB: loop body
LE: loop exit
PB: predicated region body
PF: predicated region fallthrough
CT: control target
= control target key end

     0   :  { %v515_v0 = vmov 0   ;;  %v516_v2 = vmov 0.0   ;;  %vm517_vm0 = vmmov 0   ;;  %v41_v6 = vlaneseq  ;;  %s657_s0 = inlined_call_operand.vmem [shape: s32[8,1], index: 0, kind: input, shape index: {}]   ;;  %s658_s1 = inlined_call_operand.vmem [shape: s32[8,1], index: 1, kind: input, shape index: {}]   ;;  %s659_s2 = inlined_call_operand.vmem [shape: bf16[32,16], index: 2, kind: input, shape index: {}]   ;;  %s660_s3 = inlined_call_operand.vmem [shape: bf16[48,16], index: 3, kind: input, shape index: {}]   ;;  %s661_s4 = inlined_call_operand.vmem [shape: bf16[16,64], index: 4, kind: input, shape index: {}]   ;;  %s662_s5 = inlined_call_operand.vmem [shape: bf16[16,64], index: 5, kind: input, shape index: {}]   ;;  %s663_s7 = inlined_call_operand.vmem [shape: bf16[64,32], index: 7, kind: input, shape index: {}]   ;;  %s664_s6 = inlined_call_operand.vmem [shape: f32[1,64], index: 6, kind: input, shape index: {}]   ;;  %s665_s10 = inlined_call_operand.<no memory space> [shape: f32[1,1], index: 10, kind: input, shape index: {}]   ;;  %s666_s8 = inlined_call_operand.vmem [shape: f32[1,32], index: 8, kind: input, shape index: {}]   ;;  %s667_s9 = inlined_call_operand.vmem [shape: f32[1,32], index: 9, kind: input, shape index: {}]   ;;  %s668_s11 = inlined_call_operand.vmem [shape: f32[8,1], index: 11, kind: output, shape index: {}]  }
   0x1   :  { %499 = vset.pattern.permute.xlu0 %v515_v0  ;;  %v43_v1 = vld [vmem:[%s657_s0] sm:$0xff]  ;;  %454 = vmatprep.subr.bf16.mxu1 %v516_v2  ;;  %v501_v5 = vld [vmem:[%s659_s2 + $0x8] sm:$0xff]   ;;  %vm73_vm2 = vcmask 261120   ;;  %v504_v14 = vld [vmem:[%s660_s3 + $0x10] sm:$0xff]   ;;  %vm141_vm4 = vcmask 392192   ;;  %vm197_vm5 = vcmask 130048   ;;  %v16_v46 = vstv %s665_s10 }
   0x2   :  { %45 = vperm.xlu0 %499, %v43_v1   ;;  %v500_v3 = vld [vmem:[%s659_s2] sm:$0xff]   ;;  %472 = vmatprep.subr.bf16.mxu0 %v516_v2  ;;  %v42_v7 = vand.u32 127, %v41_v6  ;;  %v503_v13 = vld [vmem:[%s660_s3 + $0x8] sm:$0xff]   ;;  %v509_v31 = vld [vmem:[%s663_s7 + $0x10] sm:$0xff]   ;;  %vm339_vm6 = vcmask 523264   ;;  %vm411_vm7 = vcmask 7168  }
   0x3   :  { %v50_v4 = vld [vmem:[%s658_s1] sm:$0xff]  ;;  %455 = vmatpush3.bf16.msra.mxu1 %v500_v3  ;;  %458 = vmatprep.mubr.msk.bf16.mxu1 %vm517_vm0, %v516_v2  ;;  %v508_v30 = vld [vmem:[%s663_s7 + $0x8] sm:$0xff]   ;;  %v510_v32 = vld [vmem:[%s663_s7 + $0x18] sm:$0xff]   ;;  %17 = vst [vmem:[#allocation2] sm:$0x1] %v16_v46 }
   0x4   :  { %456 = vmatprep.subr.bf16.mxu1 %v516_v2  ;;  %474 = vmatprep.mubr.msk.bf16.mxu0 %vm517_vm0, %v516_v2  ;;  %v502_v10 = vld [vmem:[%s660_s3] sm:$0xff]  }
   0x5   :  { %v505_v17 = vld [vmem:[%s661_s4] sm:$0xff]  }
   0x6   :  { %52 = vperm.xlu0 %499, %v50_v4   ;;  %v506_v18 = vld [vmem:[%s662_s5] sm:$0xff]  }
   0x7   :  { %457 = vmatpush3.bf16.msra.mxu1 %v501_v5  ;;  %473 = vmatpush3.bf16.msra.mxu0 %v506_v18  ;;  %v507_v29 = vld [vmem:[%s663_s7] sm:$0xff]  }
   0x8   :  { %462 = vmatprep.subr.bf16.mxu1 %v516_v2  ;;  %484 = vmatprep.subr.bf16.mxu0 %v516_v2  ;;  %v428_v38 = vld [vmem:[%s664_s6] ss:$0 sm:$0xff] }
   0x9   :  { %v429_v47 = vld [vmem:[%s666_s8] ss:$0 sm:$0xff] }
   0xa   :  { %v435_v52 = vld [vmem:[%s667_s9] ss:$0 sm:$0xff] }
   0xb   :  { %v436_v57 = vld [vmem:[#allocation2] ss:$0 sm:$0xff] }
  0x81   :  { %v46_v8 = vpop.permute.xlu0 %45 }
  0x82   :  { %vm47_vm1 = vcmp.eq.s32.totalorder %v46_v8, %v42_v7 }
  0x83   :  { %v48_v9 = vsel %vm47_vm1, 1.0, %v516_v2 }
  0x84   :  { %v49_v11 = vpack.c.bf16 %v48_v9, %v48_v9 }
  0x85   :  { %v53_v12 = vpop.permute.xlu0 %52 }
  0x86   :  { %459 = vmatmul.mubr.msk.bf16.vlgmr.msra.gmra.mrb[0].mxu1 %vm73_vm2, %v49_v11  ;;  %vm54_vm3 = vcmp.eq.s32.totalorder %v53_v12, %v42_v7 }
  0x87   :  { %463 = vmatpush3.bf16.msra.mxu1 %v502_v10  ;;  %468 = vmatprep.mubr.msk.bf16.mxu1 %vm517_vm0, %v516_v2  ;;  %v55_v15 = vsel %vm54_vm3, 1.0, %v516_v2 }
  0x88   :  { %464 = vmatprep.subr.bf16.mxu1 %v516_v2  ;;  %v56_v16 = vpack.c.bf16 %v55_v15, %v55_v15 }
  0x8b   :  { %465 = vmatpush3.bf16.msra.mxu1 %v503_v13 }
  0x8c   :  { %466 = vmatprep.subr.bf16.mxu1 %v516_v2 }
  0x8f   :  { %467 = vmatpush3.bf16.msra.mxu1 %v504_v14 }
  0x90   :  { %478 = vmatprep.subr.bf16.mxu1 %v516_v2 }
  0x92   :  { %469 = vmatmul.mubr.msk.bf16.vlgmr.msra.gmra.mrb[4].mxu1 %vm141_vm4, %v56_v16 }
  0x93   :  { %480 = vmatprep.mubr.msk.bf16.mxu1 %vm517_vm0, %v516_v2  ;;  %479 = vmatpush3.bf16.msra.mxu1 %v505_v17 }
 0x159   :  { %v111_v19 = vpop.f32.mrb[0].mxu1 }
 0x15a   :  { %v185_v20 = vpack.c.bf16 %v111_v19, %v111_v19  ;;  %v460_v21 = vpop.f32.mrb[1].mxu1 }
 0x15b   :  { %v114_v22 = vpop.f32.mrb[2].mxu1 }
 0x15c   :  { %v461_v23 = vpop.f32.mrb[3].mxu1  ;;  %481 = vmatmul.mubr.msk.bf16.vlgmr.msra.gmra.mrb[8].mxu1 %vm197_vm5, %v185_v20 }
 0x165   :  { %v179_v24 = vpop.f32.mrb[4].mxu1 }
 0x166   :  { %v188_v25 = vpack.c.bf16 %v179_v24, %v179_v24  ;;  %v470_v26 = vpop.f32.mrb[5].mxu1 }
 0x167   :  { %v182_v27 = vpop.f32.mrb[6].mxu1 }
 0x168   :  { %v471_v28 = vpop.f32.mrb[7].mxu1  ;;  %475 = vmatmul.mubr.msk.bf16.vlgmr.msra.gmra.mrb[0].mxu0 %vm197_vm5, %v188_v25 }
 0x169   :  { %492 = vmatprep.mubr.msk.bf16.mxu0 %vm517_vm0, %v516_v2  ;;  %485 = vmatpush3.bf16.msra.mxu0 %v507_v29 }
 0x16a   :  { %486 = vmatprep.subr.bf16.mxu0 %v516_v2 }
 0x16d   :  { %487 = vmatpush3.bf16.msra.mxu0 %v508_v30 }
 0x16e   :  { %488 = vmatprep.subr.bf16.mxu0 %v516_v2 }
 0x171   :  { %489 = vmatpush3.bf16.msra.mxu0 %v509_v31 }
 0x172   :  { %490 = vmatprep.subr.bf16.mxu0 %v516_v2 }
 0x175   :  { %491 = vmatpush3.bf16.msra.mxu0 %v510_v32 }
 0x22f   :  { %v284_v33 = vpop.f32.mrb[8].mxu1 }
 0x230   :  { %v482_v34 = vpop.f32.mrb[9].mxu1 }
 0x231   :  { %v287_v35 = vpop.f32.mrb[10].mxu1 }
 0x232   :  { %v483_v36 = vpop.f32.mrb[11].mxu1 }
 0x23b   :  { %v235_v37 = vpop.f32.mrb[0].mxu0 }
 0x23c   :  { %v285_v39 = vadd.f32 %v284_v33, %v235_v37  ;;  %v476_v40 = vpop.f32.mrb[1].mxu0 }
 0x23d   :  { %v238_v41 = vpop.f32.mrb[2].mxu0 }
 0x23e   :  { %v297_v42 = vadd.f32 %v428_v38, %v285_v39  ;;  %v477_v43 = vpop.f32.mrb[3].mxu0 }
 0x240   :  { %v298_v44 = vmax.f32 %v297_v42, 0.0 }
 0x242   :  { %v299_v45 = vpack.c.bf16 %v298_v44, %v298_v44 }
 0x244   :  { %493 = vmatmul.mubr.msk.bf16.vlgmr.msra.gmra.mrb[4].mxu0 %vm339_vm6, %v299_v45 }
 0x317   :  { %v377_v48 = vpop.f32.mrb[4].mxu0 }
 0x318   :  { %v378_v49 = vadd.f32 %v429_v47, %v377_v48  ;;  %v494_v50 = vpop.f32.mrb[5].mxu0 }
 0x319   :  { %v380_v51 = vpop.f32.mrb[6].mxu0 }
 0x31a   :  { %v383_v53 = vmax.f32 %v378_v49, 0.0  ;;  %v495_v54 = vpop.f32.mrb[7].mxu0 }
 0x31c   :  { %v391_v55 = vmul.f32 %v435_v52, %v383_v53 }
 0x31e   :  { %v392_v56 = vsel %vm73_vm2, %v391_v55, 0.0 }
 0x31f   :  { %393 = vadd.xlane.f32.xlu1 %v392_v56 }
 0x3ac   :  { %v394_v58 = vpop.xlane.xlu1 %393 }
 0x3ad   :  { %v402_v59 = vadd.f32 %v436_v57, %v394_v58 }
 0x3af   :  { %v437_v60 = vmul.f32 -1.442695, %v402_v59 }
 0x3b1   :  { %511 = vpow2.f32 %v437_v60 }
 0x3bb   :  { %v512_v61 = vpop.eup %511 }
 0x3bc   :  { %v406_v62 = vadd.f32 1.0, %v512_v61 }
 0x3be   :  { %513 = vrcp.f32 %v406_v62 }
 0x3c8   :  { %v514_v63 = vpop.eup %513 }
 0x3c9   :  { %v409_v0 = vmul.f32 4.5, %v514_v63 }
 0x3cb   :  { %v410_v1 = vadd.f32 0.5, %v409_v0 }
 0x3cd   :  { %412 = vst.msk [vmem:[%s668_s11] sm:$0xff] %vm411_vm7, %v410_v1 }

</bundles_post_ra>
